<compile_context>
chip_gen: v6e
topology: v6e:2x2x1
jax: 0.10.0
libtpu: 0.0.40
codegen_flags: <defaults>
</compile_context>

<pallas_src>
import functools

import jax
import jax.numpy as jnp
from jax.experimental import pallas as pl
from jax.experimental.pallas import tpu as pltpu  # noqa: F401  (TPU backend)


def _p1gcn_fused_kernel(a_ref, x_ref, w1_ref, b1_ref, w2_ref, b2_ref, o_ref,
                        *, num_features, hidden1):
    """Fused conv1 -> ReLU -> (dropout=id) -> conv4 for the whole graph."""
    F_in = num_features
    H1 = hidden1

    # Cast once inside the kernel (inputs arrive as f32; no bf16 HBM copies).
    a = a_ref[...].astype(jnp.bfloat16)                    # (N, N)
    x = x_ref[...].astype(jnp.bfloat16)                    # (N, F)
    w1 = w1_ref[...].astype(jnp.bfloat16)                  # (2F, H1) fused Linear
    w2 = w2_ref[...].astype(jnp.bfloat16)                  # (2H1, C) fused Linear

    # --- conv1: gather1 (self + neighbor reduction) -> Linear(2F -> H1) -----
    # Split the fused weight into self / neighbor halves and accumulate two
    # MXU matmuls in f32 instead of building a concat'd (N, 2F) operand.
    agg1 = jnp.dot(a, x, preferred_element_type=jnp.float32)            # (N, F)
    h = (jnp.dot(x, w1[:F_in, :], preferred_element_type=jnp.float32)
         + jnp.dot(agg1.astype(jnp.bfloat16), w1[F_in:, :],
                   preferred_element_type=jnp.float32)
         + b1_ref[...])
    h = jnp.maximum(h, 0.0)                                # ReLU
    # Dropout(p=0.6): eval-mode identity.

    # Single f32->bf16 pack, reused for both operands of layer 2.
    h_bf = h.astype(jnp.bfloat16)                          # (N, H1)

    # --- conv4: gather1 -> Linear(2*H1 -> C) ---------------------------------
    agg2 = jnp.dot(a, h_bf, preferred_element_type=jnp.float32)         # (N, H1)
    y = (jnp.dot(h_bf, w2[:H1, :], preferred_element_type=jnp.float32)
         + jnp.dot(agg2.astype(jnp.bfloat16), w2[H1:, :],
                   preferred_element_type=jnp.float32)
         + b2_ref[...])
    # ptens.linmaps0(x, False): identity for singleton reference domains.
    o_ref[...] = y.astype(o_ref.dtype)


def p1gcn0_forward(x, a_norm, params):
    """Full P1GCN0 forward (both ConvolutionalLayer_1P layers) in one call."""
    N, F_in = x.shape
    w1, b1 = params["w1"], params["b1"]
    w2, b2 = params["w2"], params["b2"]
    H1 = w1.shape[1]
    C = w2.shape[1]

    kernel = functools.partial(_p1gcn_fused_kernel,
                               num_features=F_in, hidden1=H1)
    # No grid: whole (small) problem resident in VMEM, single kernel invocation.
    return pl.pallas_call(
        kernel,
        out_shape=jax.ShapeDtypeStruct((N, C), jnp.float32),
    )(a_norm, x, w1, b1, w2, b2)


def _reference_forward(x, a_norm, params):
    """Pure-JAX reference mirroring the kernel's bf16/f32 precision choices."""
    F_in = x.shape[1]
    H1 = params["w1"].shape[1]
    a = a_norm.astype(jnp.bfloat16)
    xb = x.astype(jnp.bfloat16)
    w1 = params["w1"].astype(jnp.bfloat16)
    w2 = params["w2"].astype(jnp.bfloat16)

    agg1 = jnp.dot(a, xb, preferred_element_type=jnp.float32)
    h = (jnp.dot(xb, w1[:F_in, :], preferred_element_type=jnp.float32)
         + jnp.dot(agg1.astype(jnp.bfloat16), w1[F_in:, :],
                   preferred_element_type=jnp.float32)
         + params["b1"])
    h = jnp.maximum(h, 0.0)
    hb = h.astype(jnp.bfloat16)
    agg2 = jnp.dot(a, hb, preferred_element_type=jnp.float32)
    return (jnp.dot(hb, w2[:H1, :], preferred_element_type=jnp.float32)
            + jnp.dot(agg2.astype(jnp.bfloat16), w2[H1:, :],
                      preferred_element_type=jnp.float32)
            + params["b2"])


def init_params(key, num_features, hidden1, num_classes):
    """torch.nn.Linear-style deterministic init; weights kept fused (2F, H)."""
    k1, k2, k3, k4 = jax.random.split(key, 4)

    def lin(k, fan_in, shape):
        bound = 1.0 / jnp.sqrt(fan_in)
        return jax.random.uniform(k, shape, jnp.float32, -bound, bound)

    fan1 = 2 * num_features   # Linear(channels_in * 2, hidden1)
    fan2 = 2 * hidden1        # Linear(hidden1 * 2, num_classes)
    return {
        "w1": lin(k1, fan1, (fan1, hidden1)),
        "b1": lin(k2, fan1, (1, hidden1)),
        "w2": lin(k3, fan2, (fan2, num_classes)),
        "b2": lin(k4, fan2, (1, num_classes)),
    }


if __name__ == "__main__":
    N = 128            # number of nodes
    NUM_FEATURES = 32  # dataset.num_features (scaled down)
    HIDDEN1 = 16       # hidden_channels1
    NUM_CLASSES = 8    # dataset.num_classes (scaled)
    REDUCTION_TYPE = "mean"

    root = jax.random.PRNGKey(0)
    kx, ke1, ke2 = jax.random.split(root, 3)

    # Node features + NormalizeFeatures transform (row-normalize to sum 1).
    x = jax.random.uniform(kx, (N, NUM_FEATURES), jnp.float32)
    x = x / jnp.maximum(x.sum(axis=-1, keepdims=True), 1e-6)

    # Deterministic random undirected edge_index, no self loops.
    num_edges = 512
    src = jax.random.randint(ke1, (num_edges,), 0, N)
    dst = jax.random.randint(ke2, (num_edges,), 0, N)
    edge_index = jnp.stack([jnp.concatenate([src, dst]),
                            jnp.concatenate([dst, src])])

    # Glue: densify the graph and apply the reduction normalization.
    # TODO(synk): for realistic (sparse) graph sizes, replace the dense A@X with
    # a scalar-prefetch-driven gather (edge/segment offsets in SMEM).
    adj = jnp.zeros((N, N), jnp.float32).at[edge_index[0], edge_index[1]].set(1.0)
    adj = adj * (1.0 - jnp.eye(N, dtype=jnp.float32))
    if REDUCTION_TYPE == "mean":
        deg = adj.sum(axis=1, keepdims=True)
        a_norm = adj / jnp.maximum(deg, 1.0)
    else:  # "sum"
        a_norm = adj

    params = init_params(jax.random.PRNGKey(12345), NUM_FEATURES, HIDDEN1,
                         NUM_CLASSES)

    out = p1gcn0_forward(x, a_norm, params)
    out = jax.block_until_ready(out)

    assert out.shape == (N, NUM_CLASSES) and out.dtype == jnp.float32
    assert bool(jnp.all(jnp.isfinite(out)))
    ref = _reference_forward(x, a_norm, params)
    assert bool(jnp.allclose(out, ref, rtol=2e-2, atol=2e-3)), \
        float(jnp.max(jnp.abs(out - ref)))
    print("KERNEL_OK")
</pallas_src>

<mosaic_0001>
module attributes {stable_mosaic.version = 11 : i64} {
  func.func @_p1gcn_fused_kernel(%arg0: memref<128x128xf32, #tpu.memory_space<vmem>>, %arg1: memref<128x32xf32, #tpu.memory_space<vmem>>, %arg2: memref<64x16xf32, #tpu.memory_space<vmem>>, %arg3: memref<1x16xf32, #tpu.memory_space<vmem>>, %arg4: memref<32x8xf32, #tpu.memory_space<vmem>>, %arg5: memref<1x8xf32, #tpu.memory_space<vmem>>, %arg6: memref<128x8xf32, #tpu.memory_space<vmem>>) attributes {dimension_semantics = [], scalar_prefetch = 0 : i64, scratch_operands = 0 : i64, tpu.core_type = #tpu.core_type<tc>} {
    %c0 = arith.constant 0 : index
    %c0_0 = arith.constant 0 : index
    %0 = vector.load %arg0[%c0, %c0_0] : memref<128x128xf32, #tpu.memory_space<vmem>>, vector<128x128xf32>
    %1 = arith.truncf %0 : vector<128x128xf32> to vector<128x128xbf16>
    %c0_1 = arith.constant 0 : index
    %c0_2 = arith.constant 0 : index
    %2 = vector.load %arg1[%c0_1, %c0_2] : memref<128x32xf32, #tpu.memory_space<vmem>>, vector<128x32xf32>
    %3 = arith.truncf %2 : vector<128x32xf32> to vector<128x32xbf16>
    %c0_3 = arith.constant 0 : index
    %c0_4 = arith.constant 0 : index
    %4 = vector.load %arg2[%c0_3, %c0_4] : memref<64x16xf32, #tpu.memory_space<vmem>>, vector<64x16xf32>
    %5 = arith.truncf %4 : vector<64x16xf32> to vector<64x16xbf16>
    %c0_5 = arith.constant 0 : index
    %c0_6 = arith.constant 0 : index
    %6 = vector.load %arg4[%c0_5, %c0_6] : memref<32x8xf32, #tpu.memory_space<vmem>>, vector<32x8xf32>
    %7 = arith.truncf %6 : vector<32x8xf32> to vector<32x8xbf16>
    %cst = arith.constant dense<0.000000e+00> : vector<128x32xf32>
    %8 = tpu.matmul %1, %3, %cst {dimension_numbers = #tpu.dot_dimension_numbers<[1], [0], [0], [1], [0, 0, 1, 1], [], []>} : vector<128x128xbf16>, vector<128x32xbf16>, vector<128x32xf32> -> vector<128x32xf32>
    %9 = vector.extract_strided_slice %5 {offsets = [0, 0], sizes = [32, 16], strides = [1, 1]} : vector<64x16xbf16> to vector<32x16xbf16>
    %cst_7 = arith.constant dense<0.000000e+00> : vector<128x16xf32>
    %10 = tpu.matmul %3, %9, %cst_7 {dimension_numbers = #tpu.dot_dimension_numbers<[1], [0], [0], [1], [0, 0, 1, 1], [], []>} : vector<128x32xbf16>, vector<32x16xbf16>, vector<128x16xf32> -> vector<128x16xf32>
    %11 = arith.truncf %8 : vector<128x32xf32> to vector<128x32xbf16>
    %12 = vector.extract_strided_slice %5 {offsets = [32, 0], sizes = [32, 16], strides = [1, 1]} : vector<64x16xbf16> to vector<32x16xbf16>
    %cst_8 = arith.constant dense<0.000000e+00> : vector<128x16xf32>
    %13 = tpu.matmul %11, %12, %cst_8 {dimension_numbers = #tpu.dot_dimension_numbers<[1], [0], [0], [1], [0, 0, 1, 1], [], []>} : vector<128x32xbf16>, vector<32x16xbf16>, vector<128x16xf32> -> vector<128x16xf32>
    %14 = arith.addf %10, %13 : vector<128x16xf32>
    %c0_9 = arith.constant 0 : index
    %c0_10 = arith.constant 0 : index
    %15 = vector.load %arg3[%c0_9, %c0_10] : memref<1x16xf32, #tpu.memory_space<vmem>>, vector<1x16xf32>
    %16 = vector.broadcast %15 : vector<1x16xf32> to vector<128x16xf32>
    %17 = arith.addf %14, %16 : vector<128x16xf32>
    %cst_11 = arith.constant 0.000000e+00 : f32
    %18 = vector.broadcast %cst_11 : f32 to vector<128x16xf32>
    %19 = arith.maximumf %17, %18 : vector<128x16xf32>
    %20 = arith.truncf %19 : vector<128x16xf32> to vector<128x16xbf16>
    %cst_12 = arith.constant dense<0.000000e+00> : vector<128x16xf32>
    %21 = tpu.matmul %1, %20, %cst_12 {dimension_numbers = #tpu.dot_dimension_numbers<[1], [0], [0], [1], [0, 0, 1, 1], [], []>} : vector<128x128xbf16>, vector<128x16xbf16>, vector<128x16xf32> -> vector<128x16xf32>
    %22 = vector.extract_strided_slice %7 {offsets = [0, 0], sizes = [16, 8], strides = [1, 1]} : vector<32x8xbf16> to vector<16x8xbf16>
    %cst_13 = arith.constant dense<0.000000e+00> : vector<128x8xf32>
    %23 = tpu.matmul %20, %22, %cst_13 {dimension_numbers = #tpu.dot_dimension_numbers<[1], [0], [0], [1], [0, 0, 1, 1], [], []>} : vector<128x16xbf16>, vector<16x8xbf16>, vector<128x8xf32> -> vector<128x8xf32>
    %24 = arith.truncf %21 : vector<128x16xf32> to vector<128x16xbf16>
    %25 = vector.extract_strided_slice %7 {offsets = [16, 0], sizes = [16, 8], strides = [1, 1]} : vector<32x8xbf16> to vector<16x8xbf16>
    %cst_14 = arith.constant dense<0.000000e+00> : vector<128x8xf32>
    %26 = tpu.matmul %24, %25, %cst_14 {dimension_numbers = #tpu.dot_dimension_numbers<[1], [0], [0], [1], [0, 0, 1, 1], [], []>} : vector<128x16xbf16>, vector<16x8xbf16>, vector<128x8xf32> -> vector<128x8xf32>
    %27 = arith.addf %23, %26 : vector<128x8xf32>
    %c0_15 = arith.constant 0 : index
    %c0_16 = arith.constant 0 : index
    %28 = vector.load %arg5[%c0_15, %c0_16] : memref<1x8xf32, #tpu.memory_space<vmem>>, vector<1x8xf32>
    %29 = vector.broadcast %28 : vector<1x8xf32> to vector<128x8xf32>
    %30 = arith.addf %27, %29 : vector<128x8xf32>
    %c0_17 = arith.constant 0 : index
    %c0_18 = arith.constant 0 : index
    %31 = vector.load %arg6[%c0_17, %c0_18] : memref<128x8xf32, #tpu.memory_space<vmem>>, vector<128x8xf32>
    tpu.vector_store %arg6[%c0_17, %c0_18], %30 {strides = array<i32>} : memref<128x8xf32, #tpu.memory_space<vmem>>, vector<128x8xf32>,
    return
  }
}

</mosaic_0001>

<bundles_post_ra>
// kernel: tpu_custom_call.1
= control target key start
LH: loop header
LB: loop body
LE: loop exit
PB: predicated region body
PF: predicated region fallthrough
CT: control target
= control target key end

     0   :  { %vm195_vm0 = vcmask 261120   ;;  %vm590_vm1 = vcmask 130048   ;;  %vm856_vm2 = vcmask 64512   ;;  %s1551_s1 = inlined_call_operand.vmem [shape: f32[128,32], index: 1, kind: input, shape index: {}]   ;;  %s1552_s0 = inlined_call_operand.vmem [shape: f32[128,128], index: 0, kind: input, shape index: {}]   ;;  %s1553_s2 = inlined_call_operand.vmem [shape: f32[64,16], index: 2, kind: input, shape index: {}]   ;;  %s1554_s3 = inlined_call_operand.vmem [shape: f32[1,16], index: 3, kind: input, shape index: {}]   ;;  %s1555_s4 = inlined_call_operand.vmem [shape: f32[32,8], index: 4, kind: input, shape index: {}]   ;;  %s1556_s5 = inlined_call_operand.vmem [shape: f32[1,8], index: 5, kind: input, shape index: {}]   ;;  %s1557_s6 = inlined_call_operand.vmem [shape: f32[128,8], index: 6, kind: output, shape index: {}]  }
   0x1   :  { %v62_v0 = vld [vmem:[%s1551_s1 + $0x70] sm:$0xff]  ;;  %v63_v1 = vld [vmem:[%s1551_s1 + $0x78] sm:$0xff]  ;;  %v60_v2 = vld [vmem:[%s1551_s1 + $0x60] sm:$0xff] }
   0x2   :  { %v1181_v3 = vpack.c.bf16 %v63_v1, %v62_v0  ;;  %v61_v4 = vld [vmem:[%s1551_s1 + $0x68] sm:$0xff]  ;;  %v58_v6 = vld [vmem:[%s1551_s1 + $0x50] sm:$0xff]  ;;  %v59_v7 = vld [vmem:[%s1551_s1 + $0x58] sm:$0xff] }
   0x3   :  { %v1186_v5 = vpack.c.bf16 %v61_v4, %v60_v2  ;;  %v1197_v8 = vpack.c.bf16 %v59_v7, %v58_v6  ;;  %v24_v9 = vld [vmem:[%s1552_s0] sm:$0xff]  ;;  %v25_v10 = vld [vmem:[%s1552_s0 + $0x8] sm:$0xff]  ;;  %v54_v15 = vld [vmem:[%s1551_s1 + $0x30] sm:$0xff] }
   0x4   :  { %981 = vmatprep.subr.bf16.mxu0 %v1181_v3  ;;  %v56_v11 = vld [vmem:[%s1551_s1 + $0x40] sm:$0xff]  ;;  %v57_v12 = vld [vmem:[%s1551_s1 + $0x48] sm:$0xff]  ;;  %v40_v13 = vpack.c.bf16 %v25_v10, %v24_v9  ;;  %v55_v16 = vld [vmem:[%s1551_s1 + $0x38] sm:$0xff] }
   0x5   :  { %982 = vmatpush3.bf16.msra.mxu0 %v1181_v3  ;;  %v1213_v14 = vpack.c.bf16 %v57_v12, %v56_v11  ;;  %v1223_v17 = vpack.c.bf16 %v55_v16, %v54_v15  ;;  %v52_v18 = vld [vmem:[%s1551_s1 + $0x20] sm:$0xff]  ;;  %v53_v19 = vld [vmem:[%s1551_s1 + $0x28] sm:$0xff]  ;;  %v50_v21 = vld [vmem:[%s1551_s1 + $0x10] sm:$0xff] }
   0x6   :  { %983 = vmatprep.subr.bf16.mxu0 %v1186_v5  ;;  %997 = vmatprep.mubr.bf16.mxu0 %v40_v13  ;;  %v1233_v20 = vpack.c.bf16 %v53_v19, %v52_v18  ;;  %v51_v22 = vld [vmem:[%s1551_s1 + $0x18] sm:$0xff]  ;;  %v48_v24 = vld [vmem:[%s1551_s1] sm:$0xff]  ;;  %v49_v25 = vld [vmem:[%s1551_s1 + $0x8] sm:$0xff] }
   0x7   :  { %v1243_v23 = vpack.c.bf16 %v51_v22, %v50_v21  ;;  %v1253_v26 = vpack.c.bf16 %v49_v25, %v48_v24  ;;  %v26_v27 = vld [vmem:[%s1552_s0 + $0x10] sm:$0xff]  ;;  %v27_v28 = vld [vmem:[%s1552_s0 + $0x18] sm:$0xff]  ;;  %v28_v29 = vld [vmem:[%s1552_s0 + $0x20] sm:$0xff] }
   0x8   :  { %v29_v30 = vld [vmem:[%s1552_s0 + $0x28] sm:$0xff]  ;;  %v1269_v31 = vpack.c.bf16 %v27_v28, %v26_v27  ;;  %v30_v33 = vld [vmem:[%s1552_s0 + $0x30] sm:$0xff]  ;;  %v31_v34 = vld [vmem:[%s1552_s0 + $0x38] sm:$0xff] }
   0x9   :  { %984 = vmatpush3.bf16.msra.mxu0 %v1186_v5  ;;  %v1272_v32 = vpack.c.bf16 %v29_v30, %v28_v29  ;;  %v32_v35 = vld [vmem:[%s1552_s0 + $0x40] sm:$0xff]  ;;  %v33_v36 = vld [vmem:[%s1552_s0 + $0x48] sm:$0xff]  ;;  %v1288_v37 = vpack.c.bf16 %v31_v34, %v30_v33  ;;  %v34_v39 = vld [vmem:[%s1552_s0 + $0x50] sm:$0xff] }
   0xa   :  { %985 = vmatprep.subr.bf16.mxu0 %v1197_v8  ;;  %v1290_v38 = vpack.c.bf16 %v33_v36, %v32_v35  ;;  %v35_v40 = vld [vmem:[%s1552_s0 + $0x58] sm:$0xff]  ;;  %v36_v41 = vld [vmem:[%s1552_s0 + $0x60] sm:$0xff]  ;;  %v37_v42 = vld [vmem:[%s1552_s0 + $0x68] sm:$0xff] }
   0xb   :  { %v1306_v43 = vpack.c.bf16 %v35_v40, %v34_v39  ;;  %v1308_v44 = vpack.c.bf16 %v37_v42, %v36_v41  ;;  %v38_v45 = vld [vmem:[%s1552_s0 + $0x70] sm:$0xff]  ;;  %v39_v46 = vld [vmem:[%s1552_s0 + $0x78] sm:$0xff]  ;;  %v76_v51 = vld [vmem:[%s1553_s2 + $0x20] sm:$0xff] }
   0xc   :  { %v1318_v47 = vpack.c.bf16 %v39_v46, %v38_v45  ;;  %v78_v48 = vld [vmem:[%s1553_s2 + $0x30] sm:$0xff]  ;;  %v79_v49 = vld [vmem:[%s1553_s2 + $0x38] sm:$0xff]  ;;  %v77_v52 = vld [vmem:[%s1553_s2 + $0x28] sm:$0xff] }
   0xd   :  { %986 = vmatpush3.bf16.msra.mxu0 %v1197_v8  ;;  %v83_v50 = vpack.c.bf16 %v79_v49, %v78_v48  ;;  %v82_v53 = vpack.c.bf16 %v77_v52, %v76_v51  ;;  %v74_v54 = vld [vmem:[%s1553_s2 + $0x10] sm:$0xff]  ;;  %v75_v55 = vld [vmem:[%s1553_s2 + $0x18] sm:$0xff]  ;;  %v72_v60 = vld [vmem:[%s1553_s2] sm:$0xff] }
   0xe   :  { %987 = vmatprep.subr.bf16.mxu0 %v1213_v14  ;;  %v81_v56 = vpack.c.bf16 %v75_v55, %v74_v54  ;;  %v73_v61 = vld [vmem:[%s1553_s2 + $0x8] sm:$0xff]  ;;  %v1377_v42 = vld [vmem:[%s1554_s3] ss:$0 sm:$0xff] }
   0xf   :  { %1013 = vmatprep.subr.bf16.mxu1 %v83_v50  ;;  %v80_v2 = vpack.c.bf16 %v73_v61, %v72_v60 }
  0x10   :  { %1014 = vmatpush3.bf16.msra.mxu1 %v83_v50 }
  0x11   :  { %988 = vmatpush3.bf16.msra.mxu0 %v1213_v14  ;;  %1015 = vmatprep.subr.bf16.mxu1 %v82_v53 }
  0x12   :  { %989 = vmatprep.subr.bf16.mxu0 %v1223_v17 }
  0x14   :  { %1016 = vmatpush3.bf16.msra.mxu1 %v82_v53 }
  0x15   :  { %990 = vmatpush3.bf16.msra.mxu0 %v1223_v17  ;;  %1033 = vmatprep.subr.bf16.mxu1 %v81_v56 }
  0x16   :  { %991 = vmatprep.subr.bf16.mxu0 %v1233_v20 }
  0x19   :  { %992 = vmatpush3.bf16.msra.mxu0 %v1233_v20 }
  0x1a   :  { %993 = vmatprep.subr.bf16.mxu0 %v1243_v23 }
  0x1d   :  { %994 = vmatpush3.bf16.msra.mxu0 %v1243_v23 }
  0x1e   :  { %995 = vmatprep.subr.bf16.mxu0 %v1253_v26 }
  0x21   :  { %996 = vmatpush3.bf16.msra.mxu0 %v1253_v26 }
  0x24   :  { %998 = vmatmul.mubr.bf16.vlgmr.msra.gmra.mxu0 %v1269_v31 }
  0x25   :  { %1001 = vmatprep.mubr.bf16.mxu0 %v1272_v32 }
  0x2c   :  { %1002 = vmatmul.mubr.bf16.gmra.mxu0 %v1288_v37 }
  0x2d   :  { %1005 = vmatprep.mubr.bf16.mxu0 %v1290_v38 }
  0x34   :  { %1006 = vmatmul.mubr.bf16.gmra.mxu0 %v1306_v43 }
  0x35   :  { %1009 = vmatprep.mubr.bf16.mxu0 %v1308_v44 }
  0x3c   :  { %1010 = vmatmul.mubr.bf16.gmra.mxu0 %v1318_v47 }
  0x3d   :  { %1069 = vmatprep.mubr.bf16.mxu0 %v40_v13 }
  0xe4   :  { %v999_v57 = vpop.f32.mrf.mxu0 }
  0xe6   :  { %v124_v58 = vpop.f32.mrf.mxu0 }
  0xe8   :  { %v1000_v59 = vpop.f32.mrf.mxu0 }
  0xe9   :  { %v188_v0 = vpack.c.bf16 %v1000_v59, %v999_v57 }
  0xea   :  { %v127_v62 = vpop.f32.mrf.mxu0 }
  0xeb   :  { %v187_v63 = vpack.c.bf16 %v127_v62, %v124_v58 }
  0xec   :  { %v1003_v1 = vpop.f32.mrf.mxu0 }
  0xed   :  { %1017 = vmatprep.mubr.msk.bf16.mxu1 %vm195_vm0, %v187_v63 }
  0xee   :  { %v140_v4 = vpop.f32.mrf.mxu0  ;;  %1018 = vmatmul.mubr.msk.bf16.vlgmr.msra.gmra.mxu1 %vm195_vm0, %v188_v0 }
  0xef   :  { %1034 = vmatpush3.bf16.msra.mxu1 %v81_v56 }
  0xf0   :  { %v1004_v6 = vpop.f32.mrf.mxu0  ;;  %1035 = vmatprep.subr.bf16.mxu1 %v80_v2 }
  0xf1   :  { %v190_v10 = vpack.c.bf16 %v1004_v6, %v1003_v1 }
  0xf2   :  { %v143_v7 = vpop.f32.mrf.mxu0 }
  0xf3   :  { %v189_v9 = vpack.c.bf16 %v143_v7, %v140_v4  ;;  %1036 = vmatpush3.bf16.msra.mxu1 %v80_v2 }
  0xf4   :  { %v1007_v11 = vpop.f32.mrf.mxu0 }
  0xf5   :  { %1021 = vmatprep.mubr.msk.bf16.mxu1 %vm195_vm0, %v189_v9 }
  0xf6   :  { %v156_v12 = vpop.f32.mrf.mxu0  ;;  %1022 = vmatmul.mubr.msk.bf16.gmra.mxu1 %vm195_vm0, %v190_v10 }
  0xf8   :  { %v1008_v13 = vpop.f32.mrf.mxu0 }
  0xf9   :  { %v192_v18 = vpack.c.bf16 %v1008_v13, %v1007_v11 }
  0xfa   :  { %v159_v15 = vpop.f32.mrf.mxu0 }
  0xfb   :  { %v191_v16 = vpack.c.bf16 %v159_v15, %v156_v12 }
  0xfc   :  { %v1011_v19 = vpop.f32.mrf.mxu0 }
  0xfd   :  { %1025 = vmatprep.mubr.msk.bf16.mxu1 %vm195_vm0, %v191_v16 }
  0xfe   :  { %v172_v21 = vpop.f32.mrf.mxu0  ;;  %1026 = vmatmul.mubr.msk.bf16.gmra.mxu1 %vm195_vm0, %v192_v18 }
 0x100   :  { %v1012_v22 = vpop.f32.mrf.mxu0 }
 0x101   :  { %v194_v27 = vpack.c.bf16 %v1012_v22, %v1011_v19 }
 0x102   :  { %v175_v24 = vpop.f32.mrf.mxu0 }
 0x103   :  { %v193_v25 = vpack.c.bf16 %v175_v24, %v172_v21 }
 0x105   :  { %1029 = vmatprep.mubr.msk.bf16.mxu1 %vm195_vm0, %v193_v25 }
 0x106   :  { %1030 = vmatmul.mubr.msk.bf16.gmra.mxu1 %vm195_vm0, %v194_v27 }
 0x107   :  { %1037 = vmatprep.mubr.msk.bf16.mxu1 %vm195_vm0, %v1253_v26 }
 0x10e   :  { %1038 = vmatmul.mubr.msk.bf16.vlgmr.msra.gmra.mxu1 %vm195_vm0, %v1243_v23 }
 0x10f   :  { %1041 = vmatprep.mubr.msk.bf16.mxu1 %vm195_vm0, %v1233_v20 }
 0x116   :  { %1042 = vmatmul.mubr.msk.bf16.gmra.mxu1 %vm195_vm0, %v1223_v17 }
 0x117   :  { %1045 = vmatprep.mubr.msk.bf16.mxu1 %vm195_vm0, %v1213_v14 }
 0x11e   :  { %1046 = vmatmul.mubr.msk.bf16.gmra.mxu1 %vm195_vm0, %v1197_v8 }
 0x11f   :  { %1049 = vmatprep.mubr.msk.bf16.mxu1 %vm195_vm0, %v1186_v5 }
 0x126   :  { %1050 = vmatmul.mubr.msk.bf16.gmra.mxu1 %vm195_vm0, %v1181_v3 }
 0x127   :  { %1081 = vmatprep.mubr.bf16.mxu1 %v1308_v44 }
 0x1ae   :  { %v1019_v23 = vpop.f32.mrf.mxu1 }
 0x1b0   :  { %v254_v26 = vpop.f32.mrf.mxu1 }
 0x1b2   :  { %v1020_v20 = vpop.f32.mrf.mxu1 }
 0x1b4   :  { %v257_v28 = vpop.f32.mrf.mxu1 }
 0x1b6   :  { %v1370_v29 = vpop.f32.mrf.mxu1 }
 0x1b8   :  { %v270_v17 = vpop.f32.mrf.mxu1 }
 0x1ba   :  { %v1372_v30 = vpop.f32.mrf.mxu1 }
 0x1bc   :  { %v273_v14 = vpop.f32.mrf.mxu1 }
 0x1be   :  { %v1027_v33 = vpop.f32.mrf.mxu1 }
 0x1c0   :  { %v286_v8 = vpop.f32.mrf.mxu1 }
 0x1c2   :  { %v1028_v34 = vpop.f32.mrf.mxu1 }
 0x1c4   :  { %v289_v35 = vpop.f32.mrf.mxu1 }
 0x1c6   :  { %v1031_v5 = vpop.f32.mrf.mxu1 }
 0x1c8   :  { %v302_v36 = vpop.f32.mrf.mxu1 }
 0x1ca   :  { %v1032_v39 = vpop.f32.mrf.mxu1 }
 0x1cc   :  { %v305_v3 = vpop.f32.mrf.mxu1 }
 0x1ce   :  { %v1039_v40 = vpop.f32.mrf.mxu1 }
 0x1cf   :  { %v384_v41 = vadd.f32 %v1039_v40, %v1019_v23 }
 0x1d0   :  { %v375_v44 = vpop.f32.mrf.mxu1 }
 0x1d1   :  { %v376_v45 = vadd.f32 %v375_v44, %v254_v26  ;;  %v447_v48 = vadd.f32 %v1377_v42, %v384_v41 }
 0x1d2   :  { %v1040_v46 = vpop.f32.mrf.mxu1 }
 0x1d3   :  { %v387_v49 = vadd.f32 %v1040_v46, %v1020_v20  ;;  %v445_v51 = vadd.f32 %v1377_v42, %v376_v45  ;;  %v463_v55 = vmax.f32 %v447_v48, 0.0 }
 0x1d4   :  { %v378_v50 = vpop.f32.mrf.mxu1 }
 0x1d5   :  { %v448_v52 = vadd.f32 %v1377_v42, %v387_v49  ;;  %v379_v53 = vadd.f32 %v378_v50, %v257_v28  ;;  %v461_v59 = vmax.f32 %v445_v51, 0.0 }
 0x1d6   :  { %v1043_v54 = vpop.f32.mrf.mxu1 }
 0x1d7   :  { %v464_v56 = vmax.f32 %v448_v52, 0.0  ;;  %v446_v57 = vadd.f32 %v1377_v42, %v379_v53 }
 0x1d8   :  { %v391_v58 = vpop.f32.mrf.mxu1 }
 0x1d9   :  { %v1383_v60 = vpack.c.bf16 %v464_v56, %v463_v55  ;;  %v462_v61 = vmax.f32 %v446_v57, 0.0  ;;  %v392_v62 = vadd.f32 %v391_v58, %v270_v17  ;;  %v85_v58 = vld [vmem:[%s1555_s4 + $0x8] sm:$0xff] }
 0x1da   :  { %v1044_v63 = vpop.f32.mrf.mxu1 }
 0x1db   :  { %v1385_v0 = vpack.c.bf16 %v462_v61, %v461_v59  ;;  %v449_v2 = vadd.f32 %v1377_v42, %v392_v62 }
 0x1dc   :  { %v394_v1 = vpop.f32.mrf.mxu1 }
 0x1dd   :  { %v395_v4 = vadd.f32 %v394_v1, %v273_v14  ;;  %v465_v10 = vmax.f32 %v449_v2, 0.0 }
 0x1de   :  { %v1047_v6 = vpop.f32.mrf.mxu1 }
 0x1df   :  { %v450_v7 = vadd.f32 %v1377_v42, %v395_v4  ;;  %v416_v23 = vadd.f32 %v1047_v6, %v1027_v33 }
 0x1e0   :  { %v407_v9 = vpop.f32.mrf.mxu1 }
 0x1e1   :  { %v466_v11 = vmax.f32 %v450_v7, 0.0 }
 0x1e2   :  { %v1048_v12 = vpop.f32.mrf.mxu1 }
 0x1e3   :  { %v1389_v13 = vpack.c.bf16 %v466_v11, %v465_v10  ;;  %v419_v22 = vadd.f32 %v1048_v12, %v1028_v34  ;;  %v455_v34 = vadd.f32 %v1377_v42, %v416_v23 }
 0x1e4   :  { %v410_v15 = vpop.f32.mrf.mxu1 }
 0x1e5   :  { %v456_v14 = vadd.f32 %v1377_v42, %v419_v22  ;;  %v411_v40 = vadd.f32 %v410_v15, %v289_v35  ;;  %v471_v35 = vmax.f32 %v455_v34, 0.0 }
 0x1e6   :  { %v1051_v16 = vpop.f32.mrf.mxu1 }
 0x1e7   :  { %v432_v18 = vadd.f32 %v1051_v16, %v1031_v5  ;;  %v472_v48 = vmax.f32 %v456_v14, 0.0  ;;  %v454_v49 = vadd.f32 %v1377_v42, %v411_v40  ;;  %v1469_v40 = vld [vmem:[%s1556_s5] ss:$0 sm:$0xff] }
 0x1e8   :  { %v423_v19 = vpop.f32.mrf.mxu1 }
 0x1e9   :  { %v424_v21 = vadd.f32 %v423_v19, %v302_v36  ;;  %v459_v25 = vadd.f32 %v1377_v42, %v432_v18  ;;  %v408_v36 = vadd.f32 %v407_v9, %v286_v8  ;;  %v400_v8 = vadd.f32 %v1043_v54, %v1370_v29 }
 0x1ea   :  { %v1052_v24 = vpop.f32.mrf.mxu1  ;;  %v482_v51 = vpack.c.bf16 %v472_v48, %v471_v35  ;;  %v470_v52 = vmax.f32 %v454_v49, 0.0 }
 0x1eb   :  { %v435_v27 = vadd.f32 %v1052_v24, %v1032_v39  ;;  %v457_v20 = vadd.f32 %v1377_v42, %v424_v21  ;;  %v475_v41 = vmax.f32 %v459_v25, 0.0  ;;  %v403_v39 = vadd.f32 %v1044_v63, %v1372_v30 }
 0x1ec   :  { %v426_v26 = vpop.f32.mrf.mxu1  ;;  %v453_v50 = vadd.f32 %v1377_v42, %v408_v36  ;;  %v451_v53 = vadd.f32 %v1377_v42, %v400_v8 }
 0x1ed   :  { %v460_v28 = vadd.f32 %v1377_v42, %v435_v27  ;;  %v427_v17 = vadd.f32 %v426_v26, %v305_v3  ;;  %v473_v45 = vmax.f32 %v457_v20, 0.0  ;;  %v452_v30 = vadd.f32 %v1377_v42, %v403_v39 }
 0x1ee   :  { %v469_v55 = vmax.f32 %v453_v50, 0.0  ;;  %v467_v56 = vmax.f32 %v451_v53, 0.0 }
 0x1ef   :  { %v476_v44 = vmax.f32 %v460_v28, 0.0  ;;  %v458_v5 = vadd.f32 %v1377_v42, %v427_v17  ;;  %v468_v29 = vmax.f32 %v452_v30, 0.0  ;;  %v84_v42 = vld [vmem:[%s1555_s4] sm:$0xff] }
 0x1f0   :  { %v481_v54 = vpack.c.bf16 %v470_v52, %v469_v55  ;;  %v88_v59 = vpack.c.bf16 %v85_v58, %v84_v42 }
 0x1f1   :  { %v1397_v46 = vpack.c.bf16 %v476_v44, %v475_v41  ;;  %v474_v33 = vmax.f32 %v458_v5, 0.0  ;;  %v480_v57 = vpack.c.bf16 %v468_v29, %v467_v56 }
 0x1f3   :  { %v1401_v3 = vpack.c.bf16 %v474_v33, %v473_v45  ;;  %1053 = vmatprep.subr.bf16.mxu0 %v1397_v46  ;;  %1121 = vmatprep.subr.bf16.mxu1 %v1397_v46 }
 0x1f4   :  { %1054 = vmatpush3.bf16.msra.mxu0 %v1397_v46  ;;  %1129 = vmatpush3.bf16.msra.mxu1 %v1397_v46 }
 0x1f5   :  { %1055 = vmatprep.subr.bf16.mxu0 %v1401_v3  ;;  %1122 = vmatprep.subr.bf16.mxu1 %v1401_v3 }
 0x1f8   :  { %1056 = vmatpush3.bf16.msra.mxu0 %v1401_v3  ;;  %1130 = vmatpush3.bf16.msra.mxu1 %v1401_v3 }
 0x1f9   :  { %1057 = vmatprep.subr.bf16.mxu0 %v482_v51  ;;  %1123 = vmatprep.subr.bf16.mxu1 %v482_v51 }
 0x1fc   :  { %1058 = vmatpush3.bf16.msra.mxu0 %v482_v51  ;;  %1131 = vmatpush3.bf16.msra.mxu1 %v482_v51 }
 0x1fd   :  { %1059 = vmatprep.subr.bf16.mxu0 %v481_v54  ;;  %1124 = vmatprep.subr.bf16.mxu1 %v481_v54 }
 0x200   :  { %1060 = vmatpush3.bf16.msra.mxu0 %v481_v54  ;;  %1132 = vmatpush3.bf16.msra.mxu1 %v481_v54 }
 0x201   :  { %1061 = vmatprep.subr.bf16.mxu0 %v480_v57  ;;  %1125 = vmatprep.subr.bf16.mxu1 %v480_v57 }
 0x204   :  { %1062 = vmatpush3.bf16.msra.mxu0 %v480_v57  ;;  %1133 = vmatpush3.bf16.msra.mxu1 %v480_v57 }
 0x205   :  { %1063 = vmatprep.subr.bf16.mxu0 %v1389_v13  ;;  %1126 = vmatprep.subr.bf16.mxu1 %v1389_v13 }
 0x208   :  { %1064 = vmatpush3.bf16.msra.mxu0 %v1389_v13  ;;  %1134 = vmatpush3.bf16.msra.mxu1 %v1389_v13 }
 0x209   :  { %1065 = vmatprep.subr.bf16.mxu0 %v1383_v60  ;;  %1127 = vmatprep.subr.bf16.mxu1 %v1383_v60 }
 0x20c   :  { %1066 = vmatpush3.bf16.msra.mxu0 %v1383_v60  ;;  %1135 = vmatpush3.bf16.msra.mxu1 %v1383_v60 }
 0x20d   :  { %1067 = vmatprep.subr.bf16.mxu0 %v1385_v0  ;;  %1128 = vmatprep.subr.bf16.mxu1 %v1385_v0 }
 0x210   :  { %1068 = vmatpush3.bf16.msra.mxu0 %v1385_v0  ;;  %1136 = vmatpush3.bf16.msra.mxu1 %v1385_v0 }
 0x211   :  { %1103 = vmatprep.subr.bf16.mxu0 %v88_v59 }
 0x213   :  { %1070 = vmatmul.mubr.bf16.vlgmr.msra.gmra.mxu0 %v1269_v31  ;;  %1082 = vmatmul.mubr.bf16.vlgmr.msra.gmra.mxu1 %v1318_v47  ;;  %v86_v31 = vld [vmem:[%s1555_s4 + $0x10] sm:$0xff] }
 0x214   :  { %1073 = vmatprep.mubr.bf16.mxu0 %v1272_v32  ;;  %1104 = vmatpush3.bf16.msra.mxu0 %v88_v59  ;;  %v87_v32 = vld [vmem:[%s1555_s4 + $0x18] sm:$0xff] }
 0x21b   :  { %1074 = vmatmul.mubr.bf16.gmra.mxu0 %v1288_v37  ;;  %v89_v37 = vpack.c.bf16 %v87_v32, %v86_v31 }
 0x21c   :  { %1077 = vmatprep.mubr.bf16.mxu0 %v1290_v38 }
 0x21d   :  { %1085 = vmatprep.subr.bf16.mxu1 %v89_v37 }
 0x21e   :  { %1086 = vmatpush3.bf16.msra.mxu1 %v89_v37 }
 0x223   :  { %1078 = vmatmul.mubr.bf16.gmra.mxu0 %v1306_v43 }
 0x224   :  { %1105 = vmatprep.mubr.msk.bf16.mxu0 %vm590_vm1, %v1385_v0 }
 0x22b   :  { %1106 = vmatmul.mubr.msk.bf16.vlgmr.msra.gmra.mxu0 %vm590_vm1, %v1383_v60 }
 0x22c   :  { %1109 = vmatprep.mubr.msk.bf16.mxu0 %vm590_vm1, %v1389_v13 }
 0x233   :  { %1110 = vmatmul.mubr.msk.bf16.gmra.mxu0 %vm590_vm1, %v480_v57 }
 0x234   :  { %1113 = vmatprep.mubr.msk.bf16.mxu0 %vm590_vm1, %v481_v54 }
 0x23b   :  { %1114 = vmatmul.mubr.msk.bf16.gmra.mxu0 %vm590_vm1, %v482_v51 }
 0x23c   :  { %1117 = vmatprep.mubr.msk.bf16.mxu0 %vm590_vm1, %v1401_v3 }
 0x243   :  { %1118 = vmatmul.mubr.msk.bf16.gmra.mxu0 %vm590_vm1, %v1397_v46 }
 0x2d3   :  { %v1071_v38 = vpop.f32.mrf.mxu0  ;;  %v1083_v0 = vpop.f32.mrf.mxu1 }
 0x2d5   :  { %v519_v43 = vpop.f32.mrf.mxu0  ;;  %v567_v4 = vpop.f32.mrf.mxu1 }
 0x2d7   :  { %v1072_v47 = vpop.f32.mrf.mxu0  ;;  %v1084_v11 = vpop.f32.mrf.mxu1 }
 0x2d8   :  { %v583_v62 = vpack.c.bf16 %v1072_v47, %v1071_v38  ;;  %v589_v22 = vpack.c.bf16 %v1084_v11, %v1083_v0 }
 0x2d9   :  { %v522_v60 = vpop.f32.mrf.mxu0  ;;  %v570_v15 = vpop.f32.mrf.mxu1 }
 0x2da   :  { %v582_v61 = vpack.c.bf16 %v522_v60, %v519_v43  ;;  %v588_v19 = vpack.c.bf16 %v570_v15, %v567_v4 }
 0x2db   :  { %v1075_v63 = vpop.f32.mrf.mxu0 }
 0x2dc   :  { %1087 = vmatprep.mubr.msk.bf16.mxu1 %vm590_vm1, %v582_v61 }
 0x2dd   :  { %v535_v1 = vpop.f32.mrf.mxu0  ;;  %1088 = vmatmul.mubr.msk.bf16.vlgmr.msra.gmra.mxu1 %vm590_vm1, %v583_v62 }
 0x2df   :  { %v1076_v2 = vpop.f32.mrf.mxu0 }
 0x2e0   :  { %v585_v9 = vpack.c.bf16 %v1076_v2, %v1075_v63 }
 0x2e1   :  { %v538_v6 = vpop.f32.mrf.mxu0 }
 0x2e2   :  { %v584_v7 = vpack.c.bf16 %v538_v6, %v535_v1 }
 0x2e3   :  { %v1079_v10 = vpop.f32.mrf.mxu0 }
 0x2e4   :  { %1091 = vmatprep.mubr.msk.bf16.mxu1 %vm590_vm1, %v584_v7 }
 0x2e5   :  { %v551_v12 = vpop.f32.mrf.mxu0  ;;  %1092 = vmatmul.mubr.msk.bf16.gmra.mxu1 %vm590_vm1, %v585_v9 }
 0x2e7   :  { %v1080_v13 = vpop.f32.mrf.mxu0 }
 0x2e8   :  { %v587_v21 = vpack.c.bf16 %v1080_v13, %v1079_v10 }
 0x2e9   :  { %v554_v16 = vpop.f32.mrf.mxu0 }
 0x2ea   :  { %v586_v18 = vpack.c.bf16 %v554_v16, %v551_v12 }
 0x2eb   :  { %v1107_v24 = vpop.f32.mrf.mxu0 }
 0x2ec   :  { %1095 = vmatprep.mubr.msk.bf16.mxu1 %vm590_vm1, %v586_v18 }
 0x2ed   :  { %1096 = vmatmul.mubr.msk.bf16.gmra.mxu1 %vm590_vm1, %v587_v21  ;;  %v770_v25 = vpop.f32.mrf.mxu0 }
 0x2ee   :  { %1099 = vmatprep.mubr.msk.bf16.mxu1 %vm590_vm1, %v588_v19 }
 0x2ef   :  { %v1108_v27 = vpop.f32.mrf.mxu0 }
 0x2f1   :  { %v773_v23 = vpop.f32.mrf.mxu0 }
 0x2f3   :  { %v1111_v26 = vpop.f32.mrf.mxu0 }
 0x2f5   :  { %1100 = vmatmul.mubr.msk.bf16.gmra.mxu1 %vm590_vm1, %v589_v22  ;;  %v786_v20 = vpop.f32.mrf.mxu0 }
 0x2f7   :  { %v1112_v28 = vpop.f32.mrf.mxu0 }
 0x2f9   :  { %v789_v17 = vpop.f32.mrf.mxu0 }
 0x2fb   :  { %v1115_v44 = vpop.f32.mrf.mxu0 }
 0x2fd   :  { %v802_v39 = vpop.f32.mrf.mxu0 }
 0x2ff   :  { %v1116_v30 = vpop.f32.mrf.mxu0 }
 0x301   :  { %v805_v56 = vpop.f32.mrf.mxu0 }
 0x303   :  { %v1119_v37 = vpop.f32.mrf.mxu0 }
 0x305   :  { %v818_v63 = vpop.f32.mrf.mxu0 }
 0x307   :  { %v1120_v9 = vpop.f32.mrf.mxu0 }
 0x309   :  { %v821_v18 = vpop.f32.mrf.mxu0 }
 0x39d   :  { %v1089_v14 = vpop.f32.mrf.mxu1 }
 0x39e   :  { %v779_v41 = vadd.f32 %v1107_v24, %v1089_v14 }
 0x39f   :  { %v649_v5 = vpop.f32.mrf.mxu1 }
 0x3a0   :  { %v842_v34 = vadd.f32 %v1469_v40, %v779_v41  ;;  %v771_v36 = vadd.f32 %v770_v25, %v649_v5 }
 0x3a1   :  { %v1090_v45 = vpop.f32.mrf.mxu1 }
 0x3a2   :  { %859 = vst.msk [vmem:[%s1557_s6 + $0x10] sm:$0xff] %vm856_vm2, %v842_v34  ;;  %v840_v46 = vadd.f32 %v1469_v40, %v771_v36  ;;  %v782_v33 = vadd.f32 %v1108_v27, %v1090_v45 }
 0x3a3   :  { %v652_v48 = vpop.f32.mrf.mxu1 }
 0x3a4   :  { %857 = vst.msk [vmem:[%s1557_s6] sm:$0xff] %vm856_vm2, %v840_v46  ;;  %v843_v49 = vadd.f32 %v1469_v40, %v782_v33  ;;  %v774_v3 = vadd.f32 %v773_v23, %v652_v48 }
 0x3a5   :  { %v1093_v8 = vpop.f32.mrf.mxu1 }
 0x3a6   :  { %860 = vst.msk [vmem:[%s1557_s6 + $0x18] sm:$0xff] %vm856_vm2, %v843_v49  ;;  %v841_v35 = vadd.f32 %v1469_v40, %v774_v3  ;;  %v795_v50 = vadd.f32 %v1111_v26, %v1093_v8 }
 0x3a7   :  { %v665_v51 = vpop.f32.mrf.mxu1 }
 0x3a8   :  { %858 = vst.msk [vmem:[%s1557_s6 + $0x8] sm:$0xff] %vm856_vm2, %v841_v35  ;;  %v846_v52 = vadd.f32 %v1469_v40, %v795_v50  ;;  %v787_v53 = vadd.f32 %v786_v20, %v665_v51 }
 0x3a9   :  { %v1094_v55 = vpop.f32.mrf.mxu1 }
 0x3aa   :  { %863 = vst.msk [vmem:[%s1557_s6 + $0x30] sm:$0xff] %vm856_vm2, %v846_v52  ;;  %v844_v29 = vadd.f32 %v1469_v40, %v787_v53  ;;  %v798_v54 = vadd.f32 %v1112_v28, %v1094_v55 }
 0x3ab   :  { %v668_v57 = vpop.f32.mrf.mxu1 }
 0x3ac   :  { %861 = vst.msk [vmem:[%s1557_s6 + $0x20] sm:$0xff] %vm856_vm2, %v844_v29  ;;  %v847_v42 = vadd.f32 %v1469_v40, %v798_v54  ;;  %v790_v58 = vadd.f32 %v789_v17, %v668_v57 }
 0x3ad   :  { %v1097_v59 = vpop.f32.mrf.mxu1 }
 0x3ae   :  { %864 = vst.msk [vmem:[%s1557_s6 + $0x38] sm:$0xff] %vm856_vm2, %v847_v42  ;;  %v845_v31 = vadd.f32 %v1469_v40, %v790_v58  ;;  %v811_v32 = vadd.f32 %v1115_v44, %v1097_v59 }
 0x3af   :  { %v681_v38 = vpop.f32.mrf.mxu1 }
 0x3b0   :  { %862 = vst.msk [vmem:[%s1557_s6 + $0x28] sm:$0xff] %vm856_vm2, %v845_v31  ;;  %v850_v43 = vadd.f32 %v1469_v40, %v811_v32  ;;  %v803_v47 = vadd.f32 %v802_v39, %v681_v38 }
 0x3b1   :  { %v1098_v60 = vpop.f32.mrf.mxu1 }
 0x3b2   :  { %867 = vst.msk [vmem:[%s1557_s6 + $0x50] sm:$0xff] %vm856_vm2, %v850_v43  ;;  %v848_v61 = vadd.f32 %v1469_v40, %v803_v47  ;;  %v814_v62 = vadd.f32 %v1116_v30, %v1098_v60 }
 0x3b3   :  { %v684_v0 = vpop.f32.mrf.mxu1 }
 0x3b4   :  { %865 = vst.msk [vmem:[%s1557_s6 + $0x40] sm:$0xff] %vm856_vm2, %v848_v61  ;;  %v851_v1 = vadd.f32 %v1469_v40, %v814_v62  ;;  %v806_v2 = vadd.f32 %v805_v56, %v684_v0 }
 0x3b5   :  { %v1101_v4 = vpop.f32.mrf.mxu1 }
 0x3b6   :  { %868 = vst.msk [vmem:[%s1557_s6 + $0x58] sm:$0xff] %vm856_vm2, %v851_v1  ;;  %v849_v6 = vadd.f32 %v1469_v40, %v806_v2  ;;  %v827_v7 = vadd.f32 %v1119_v37, %v1101_v4 }
 0x3b7   :  { %v697_v10 = vpop.f32.mrf.mxu1 }
 0x3b8   :  { %866 = vst.msk [vmem:[%s1557_s6 + $0x48] sm:$0xff] %vm856_vm2, %v849_v6  ;;  %v854_v11 = vadd.f32 %v1469_v40, %v827_v7  ;;  %v819_v12 = vadd.f32 %v818_v63, %v697_v10 }
 0x3b9   :  { %v1102_v13 = vpop.f32.mrf.mxu1 }
 0x3ba   :  { %871 = vst.msk [vmem:[%s1557_s6 + $0x70] sm:$0xff] %vm856_vm2, %v854_v11  ;;  %v852_v15 = vadd.f32 %v1469_v40, %v819_v12  ;;  %v830_v16 = vadd.f32 %v1120_v9, %v1102_v13 }
 0x3bb   :  { %v700_v19 = vpop.f32.mrf.mxu1 }
 0x3bc   :  { %869 = vst.msk [vmem:[%s1557_s6 + $0x60] sm:$0xff] %vm856_vm2, %v852_v15  ;;  %v855_v21 = vadd.f32 %v1469_v40, %v830_v16  ;;  %v822_v22 = vadd.f32 %v821_v18, %v700_v19 }
 0x3be   :  { %872 = vst.msk [vmem:[%s1557_s6 + $0x78] sm:$0xff] %vm856_vm2, %v855_v21  ;;  %v853_v24 = vadd.f32 %v1469_v40, %v822_v22 }
 0x3c0   :  { %870 = vst.msk [vmem:[%s1557_s6 + $0x68] sm:$0xff] %vm856_vm2, %v853_v24 }

</bundles_post_ra>
